<compile_context>
chip_gen: v6e
topology: v6e:2x2x1
jax: 0.10.0
libtpu: 0.0.40
codegen_flags: <defaults>
</compile_context>

<pallas_src>
import functools

import jax
import jax.numpy as jnp
from jax.experimental import pallas as pl
from jax.experimental.pallas import tpu as pltpu

LANE = 128      # vreg lane width
SUBLANE = 8     # vreg sublane count (f32)


def _round_up(x, m):
    return (x + m - 1) // m * m


def _make_fused_mlp_kernel(n_layers):
    """Kernel body: refs = (x, w0, b0, w1, b1, ..., o)."""

    def kernel(*refs):
        x_ref = refs[0]
        o_ref = refs[1 + 2 * n_layers]

        h = x_ref[...]                                    # bf16 activations
        for li in range(n_layers):
            w_ref = refs[1 + 2 * li]                      # bf16 [Din_p, Dout_p]
            b_ref = refs[2 + 2 * li]                      # f32  [1, Dout_p]
            acc = jnp.dot(h, w_ref[...],
                          preferred_element_type=jnp.float32)
            acc = acc + b_ref[...]                        # bias add in f32
            if li < n_layers - 1:
                # nn.Sigmoid between hidden layers; exp lowers to the EUP slot,
                # math kept in f32 for accuracy. Dropout(rate=0.0) == identity.
                acc = jax.nn.sigmoid(acc)
                h = acc.astype(jnp.bfloat16)              # next MXU operand
            else:
                h = acc                                   # final layer: Linear only
        o_ref[...] = h.astype(o_ref.dtype)

    return kernel


def mlp_forward(x, params, *, tb=128):
    """Fused MLP forward. x: [B, in_dim] f32. params: list of (w [in,out], b [out]).

    Pads batch to a multiple of `tb` (sublane aligned) and all feature dims to
    multiples of 128 (lane dense). Padded weight rows/cols are zero, so padding
    never changes the un-padded outputs (sigmoid(0)=0.5 in padded lanes is
    multiplied by zero weight rows in the next layer)."""
    B, in_dim = x.shape
    n_layers = len(params)
    dims = [in_dim] + [w.shape[1] for (w, _) in params]
    pdims = [_round_up(d, LANE) for d in dims]
    out_dim = dims[-1]

    tb = _round_up(min(tb, _round_up(B, SUBLANE)), SUBLANE)
    B_pad = _round_up(B, tb)

    # Pad + cast: x and W in bf16 (MXU), biases in f32.
    xp = (jnp.zeros((B_pad, pdims[0]), jnp.bfloat16)
          .at[:B, :in_dim].set(x.astype(jnp.bfloat16)))
    packed = []
    for li, (w, b) in enumerate(params):
        d_in, d_out = w.shape
        wp = (jnp.zeros((pdims[li], pdims[li + 1]), jnp.bfloat16)
              .at[:d_in, :d_out].set(w.astype(jnp.bfloat16)))
        bp = (jnp.zeros((1, pdims[li + 1]), jnp.float32)
              .at[0, :d_out].set(b.astype(jnp.float32)))
        packed += [wp, bp]

    grid = (B_pad // tb,)

    in_specs = [pl.BlockSpec((tb, pdims[0]), lambda i: (i, 0))]
    for li in range(n_layers):
        # Full (padded) weight / bias blocks; same block for every grid step.
        # TODO(synk): for realistic layer widths, tile the weight along Out/K
        # with an accumulator scratch and set vmem_limit_bytes so full-array
        # blocks don't blow v7x's 64 MiB VMEM.
        in_specs.append(pl.BlockSpec((pdims[li], pdims[li + 1]), lambda i: (0, 0)))
        in_specs.append(pl.BlockSpec((1, pdims[li + 1]), lambda i: (0, 0)))
    out_specs = pl.BlockSpec((tb, pdims[-1]), lambda i: (i, 0))

    flops = 2 * B_pad * sum(pdims[l] * pdims[l + 1] for l in range(n_layers))
    transcendentals = B_pad * sum(pdims[l + 1] for l in range(n_layers - 1))
    bytes_accessed = (xp.size * 2
                      + sum(int(p.size) * p.dtype.itemsize for p in packed)
                      + B_pad * pdims[-1] * 4)

    out_pad = pl.pallas_call(
        _make_fused_mlp_kernel(n_layers),
        out_shape=jax.ShapeDtypeStruct((B_pad, pdims[-1]), jnp.float32),
        grid_spec=pltpu.PrefetchScalarGridSpec(
            num_scalar_prefetch=0,
            grid=grid,
            in_specs=in_specs,
            out_specs=out_specs,
        ),
        compiler_params=pltpu.CompilerParams(
            # Batch axis is independent -> parallel (uses both TCs on v7x).
            dimension_semantics=("parallel",),
        ),
        cost_estimate=pl.CostEstimate(
            flops=flops,
            transcendentals=transcendentals,
            bytes_accessed=bytes_accessed,
        ),
    )(xp, *packed)

    return out_pad[:B, :out_dim].astype(x.dtype)


def init_mlp_params(key, in_dim, layers_size, init_kind="uniform"):
    """Mirrors MLP._init_weights_and_biases; weights stored [in, out], biases 0.
    TODO(synk): int8 (v5e/v6e) / fp8 (v7x) quantized weight path gated by
    pltpu.get_tpu_info() is not implemented."""
    params = []
    dims = [in_dim] + list(layers_size)
    for d_in, d_out in zip(dims[:-1], dims[1:]):
        key, sub = jax.random.split(key)
        if init_kind == "zeros":
            w = jnp.zeros((d_in, d_out), jnp.float32)
        elif init_kind == "uniform":
            w = jax.random.uniform(sub, (d_in, d_out), jnp.float32,
                                   minval=-0.1, maxval=0.1)
        elif init_kind == "normal":
            w = 0.001 * jax.random.normal(sub, (d_in, d_out), jnp.float32)
        else:  # xavier uniform
            limit = jnp.sqrt(6.0 / (d_in + d_out))
            w = jax.random.uniform(sub, (d_in, d_out), jnp.float32,
                                   minval=-limit, maxval=limit)
        b = jnp.zeros((d_out,), jnp.float32)
        params.append((w, b))
    return params


def mlp_reference_bf16(x, params):
    """Reference with the same numerics as the kernel (bf16 MXU operands,
    f32 accumulation / bias / sigmoid)."""
    n = len(params)
    h = x.astype(jnp.bfloat16)
    for li, (w, b) in enumerate(params):
        acc = jnp.dot(h, w.astype(jnp.bfloat16),
                      preferred_element_type=jnp.float32) + b
        if li < n - 1:
            acc = jax.nn.sigmoid(acc)
            h = acc.astype(jnp.bfloat16)
        else:
            h = acc
    return h.astype(x.dtype)


def mlp_reference_f32(x, params):
    n = len(params)
    for li, (w, b) in enumerate(params):
        x = x @ w + b
        if li < n - 1:
            x = jax.nn.sigmoid(x)
    return x


if __name__ == "__main__":
    key = jax.random.PRNGKey(0)
    key, kx, kp = jax.random.split(key, 3)

    batch = 16
    in_dim = 32
    layers_size = [64, 32, 16]   # two hidden layers + output layer

    x = jax.random.normal(kx, (batch, in_dim), jnp.float32)
    params = init_mlp_params(kp, in_dim, layers_size, init_kind="uniform")

    # tb=8 -> grid=(2,) exercises the batch-parallel axis even at demo size.
    out = mlp_forward(x, params, tb=8)
    out = jax.block_until_ready(out)

    ref_bf16 = mlp_reference_bf16(x, params)
    ref_f32 = mlp_reference_f32(x, params)

    assert out.shape == (batch, layers_size[-1])
    assert jnp.allclose(out, ref_bf16, atol=1e-3, rtol=1e-3), \
        f"max abs err (bf16-matched ref) = {jnp.max(jnp.abs(out - ref_bf16))}"
    assert jnp.allclose(out, ref_f32, atol=3e-2, rtol=3e-2), \
        f"max abs err (f32 ref) = {jnp.max(jnp.abs(out - ref_f32))}"

    # TODO(synk): dropout with rate > 0.0 in training mode would need
    # pltpu.prng_seed / pltpu.prng_random_bits; rate=0.0 / eval is identity.

    print("KERNEL_OK")
</pallas_src>

<mosaic_0001>
module attributes {stable_mosaic.version = 11 : i64} {
  func.func @kernel(%arg0: i32, %arg1: memref<8x128xbf16, #tpu.memory_space<vmem>>, %arg2: memref<128x128xbf16, #tpu.memory_space<vmem>>, %arg3: memref<1x128xf32, #tpu.memory_space<vmem>>, %arg4: memref<128x128xbf16, #tpu.memory_space<vmem>>, %arg5: memref<1x128xf32, #tpu.memory_space<vmem>>, %arg6: memref<128x128xbf16, #tpu.memory_space<vmem>>, %arg7: memref<1x128xf32, #tpu.memory_space<vmem>>, %arg8: memref<8x128xf32, #tpu.memory_space<vmem>>) attributes {dimension_semantics = [#tpu.dimension_semantics<parallel>], iteration_bounds = array<i64: 2>, scalar_prefetch = 0 : i64, scratch_operands = 0 : i64, tpu.core_type = #tpu.core_type<tc>, window_params = [{transform_indices = @transform_0, window_bounds = array<i64: 8, 128>}, {pipeline_mode = #tpu.pipeline_mode<synchronous>, transform_indices = @transform_1, window_bounds = array<i64: 128, 128>}, {pipeline_mode = #tpu.pipeline_mode<synchronous>, transform_indices = @transform_2, window_bounds = array<i64: 1, 128>}, {pipeline_mode = #tpu.pipeline_mode<synchronous>, transform_indices = @transform_3, window_bounds = array<i64: 128, 128>}, {pipeline_mode = #tpu.pipeline_mode<synchronous>, transform_indices = @transform_4, window_bounds = array<i64: 1, 128>}, {pipeline_mode = #tpu.pipeline_mode<synchronous>, transform_indices = @transform_5, window_bounds = array<i64: 128, 128>}, {pipeline_mode = #tpu.pipeline_mode<synchronous>, transform_indices = @transform_6, window_bounds = array<i64: 1, 128>}, {transform_indices = @transform_7, window_bounds = array<i64: 8, 128>}]} {
    %c0 = arith.constant 0 : index
    %c0_0 = arith.constant 0 : index
    %0 = vector.load %arg1[%c0, %c0_0] : memref<8x128xbf16, #tpu.memory_space<vmem>>, vector<8x128xbf16>
    %c0_1 = arith.constant 0 : index
    %c0_2 = arith.constant 0 : index
    %1 = vector.load %arg2[%c0_1, %c0_2] : memref<128x128xbf16, #tpu.memory_space<vmem>>, vector<128x128xbf16>
    %cst = arith.constant dense<0.000000e+00> : vector<8x128xf32>
    %2 = tpu.matmul %0, %1, %cst {dimension_numbers = #tpu.dot_dimension_numbers<[1], [0], [0], [1], [0, 0, 1, 1], [], []>} : vector<8x128xbf16>, vector<128x128xbf16>, vector<8x128xf32> -> vector<8x128xf32>
    %c0_3 = arith.constant 0 : index
    %c0_4 = arith.constant 0 : index
    %3 = vector.load %arg3[%c0_3, %c0_4] : memref<1x128xf32, #tpu.memory_space<vmem>>, vector<1x128xf32>
    %4 = vector.broadcast %3 : vector<1x128xf32> to vector<8x128xf32>
    %5 = arith.addf %2, %4 : vector<8x128xf32>
    %6 = arith.negf %5 : vector<8x128xf32>
    %7 = math.exp %6 : vector<8x128xf32>
    %cst_5 = arith.constant 1.000000e+00 : f32
    %8 = vector.broadcast %cst_5 : f32 to vector<8x128xf32>
    %9 = arith.addf %8, %7 : vector<8x128xf32>
    %10 = arith.divf %8, %9 : vector<8x128xf32>
    %11 = arith.truncf %10 : vector<8x128xf32> to vector<8x128xbf16>
    %c0_6 = arith.constant 0 : index
    %c0_7 = arith.constant 0 : index
    %12 = vector.load %arg4[%c0_6, %c0_7] : memref<128x128xbf16, #tpu.memory_space<vmem>>, vector<128x128xbf16>
    %cst_8 = arith.constant dense<0.000000e+00> : vector<8x128xf32>
    %13 = tpu.matmul %11, %12, %cst_8 {dimension_numbers = #tpu.dot_dimension_numbers<[1], [0], [0], [1], [0, 0, 1, 1], [], []>} : vector<8x128xbf16>, vector<128x128xbf16>, vector<8x128xf32> -> vector<8x128xf32>
    %c0_9 = arith.constant 0 : index
    %c0_10 = arith.constant 0 : index
    %14 = vector.load %arg5[%c0_9, %c0_10] : memref<1x128xf32, #tpu.memory_space<vmem>>, vector<1x128xf32>
    %15 = vector.broadcast %14 : vector<1x128xf32> to vector<8x128xf32>
    %16 = arith.addf %13, %15 : vector<8x128xf32>
    %17 = arith.negf %16 : vector<8x128xf32>
    %18 = math.exp %17 : vector<8x128xf32>
    %cst_11 = arith.constant 1.000000e+00 : f32
    %19 = vector.broadcast %cst_11 : f32 to vector<8x128xf32>
    %20 = arith.addf %19, %18 : vector<8x128xf32>
    %21 = arith.divf %19, %20 : vector<8x128xf32>
    %22 = arith.truncf %21 : vector<8x128xf32> to vector<8x128xbf16>
    %c0_12 = arith.constant 0 : index
    %c0_13 = arith.constant 0 : index
    %23 = vector.load %arg6[%c0_12, %c0_13] : memref<128x128xbf16, #tpu.memory_space<vmem>>, vector<128x128xbf16>
    %cst_14 = arith.constant dense<0.000000e+00> : vector<8x128xf32>
    %24 = tpu.matmul %22, %23, %cst_14 {dimension_numbers = #tpu.dot_dimension_numbers<[1], [0], [0], [1], [0, 0, 1, 1], [], []>} : vector<8x128xbf16>, vector<128x128xbf16>, vector<8x128xf32> -> vector<8x128xf32>
    %c0_15 = arith.constant 0 : index
    %c0_16 = arith.constant 0 : index
    %25 = vector.load %arg7[%c0_15, %c0_16] : memref<1x128xf32, #tpu.memory_space<vmem>>, vector<1x128xf32>
    %26 = vector.broadcast %25 : vector<1x128xf32> to vector<8x128xf32>
    %27 = arith.addf %24, %26 : vector<8x128xf32>
    %c0_17 = arith.constant 0 : index
    %c0_18 = arith.constant 0 : index
    %28 = vector.load %arg8[%c0_17, %c0_18] : memref<8x128xf32, #tpu.memory_space<vmem>>, vector<8x128xf32>
    tpu.vector_store %arg8[%c0_17, %c0_18], %27 {strides = array<i32>} : memref<8x128xf32, #tpu.memory_space<vmem>>, vector<8x128xf32>,
    return
  }
  func.func @transform_0(%arg0: i32) -> (i32, i32) {
    %c0_i32 = arith.constant 0 : i32
    %c0_i32_0 = arith.constant 0 : i32
    return %arg0, %c0_i32 : i32, i32
  }
  func.func @transform_1(%arg0: i32) -> (i32, i32) {
    %c0_i32 = arith.constant 0 : i32
    %c0_i32_0 = arith.constant 0 : i32
    %c0_i32_1 = arith.constant 0 : i32
    return %c0_i32, %c0_i32_0 : i32, i32
  }
  func.func @transform_2(%arg0: i32) -> (i32, i32) {
    %c0_i32 = arith.constant 0 : i32
    %c0_i32_0 = arith.constant 0 : i32
    %c0_i32_1 = arith.constant 0 : i32
    return %c0_i32, %c0_i32_0 : i32, i32
  }
  func.func @transform_3(%arg0: i32) -> (i32, i32) {
    %c0_i32 = arith.constant 0 : i32
    %c0_i32_0 = arith.constant 0 : i32
    %c0_i32_1 = arith.constant 0 : i32
    return %c0_i32, %c0_i32_0 : i32, i32
  }
  func.func @transform_4(%arg0: i32) -> (i32, i32) {
    %c0_i32 = arith.constant 0 : i32
    %c0_i32_0 = arith.constant 0 : i32
    %c0_i32_1 = arith.constant 0 : i32
    return %c0_i32, %c0_i32_0 : i32, i32
  }
  func.func @transform_5(%arg0: i32) -> (i32, i32) {
    %c0_i32 = arith.constant 0 : i32
    %c0_i32_0 = arith.constant 0 : i32
    %c0_i32_1 = arith.constant 0 : i32
    return %c0_i32, %c0_i32_0 : i32, i32
  }
  func.func @transform_6(%arg0: i32) -> (i32, i32) {
    %c0_i32 = arith.constant 0 : i32
    %c0_i32_0 = arith.constant 0 : i32
    %c0_i32_1 = arith.constant 0 : i32
    return %c0_i32, %c0_i32_0 : i32, i32
  }
  func.func @transform_7(%arg0: i32) -> (i32, i32) {
    %c0_i32 = arith.constant 0 : i32
    %c0_i32_0 = arith.constant 0 : i32
    return %arg0, %c0_i32 : i32, i32
  }
}

</mosaic_0001>

<bundles_post_ra>
// kernel: tpu_custom_call.1
= control target key start
LH: loop header
LB: loop body
LE: loop exit
PB: predicated region body
PF: predicated region fallthrough
CT: control target
= control target key end

     0   :  { %s1509_s0 = inlined_call_operand.hbm [shape: bf16[16,128], index: 0, kind: input, shape index: {}]   ;;  %s1510_s1 = inlined_call_operand.hbm [shape: bf16[128,128], index: 1, kind: input, shape index: {}]   ;;  %s1511_s2 = inlined_call_operand.vmem [shape: f32[1,128], index: 2, kind: input, shape index: {}]   ;;  %s1512_s3 = inlined_call_operand.hbm [shape: bf16[128,128], index: 3, kind: input, shape index: {}]   ;;  %s1513_s4 = inlined_call_operand.vmem [shape: f32[1,128], index: 4, kind: input, shape index: {}]   ;;  %s1514_s5 = inlined_call_operand.hbm [shape: bf16[128,128], index: 5, kind: input, shape index: {}]   ;;  %s1515_s6 = inlined_call_operand.vmem [shape: f32[1,128], index: 6, kind: input, shape index: {}]   ;;  %s1516_s7 = inlined_call_operand.hbm [shape: f32[16,128], index: 7, kind: output, shape index: {}]  }
   0x1   :  { %1521 = sst [smem:[#allocation15_spill]] %s1510_s1 }
   0x2   :  { %1522 = sst [smem:[#allocation16_spill]] %s1512_s3 }
   0x3   :  { %12 = vsyncpa [#allocation3], 0 }
   0x4   :  { %14 = vsyncpa [#allocation3 + $0x1], 0 }
   0x5   :  { %15 = vsyncpa [#allocation6], 0 }
   0x6   :  { %16 = vsyncpa [#allocation9], 0 }
   0x7   :  { %17 = vsyncpa [#allocation4], 0 }
   0x8   :  { %19 = vsyncpa [#allocation4 + $0x1], 0  ;;  %s1277_s24 = smov 0   ;;  %s1279_s25 = smov 0  }
   0x9   :  { %s1281_s26 = smov 0   ;;  %s1283_s27 = smov 0  }
   0xa LB: > { %s1298_s28 = sadd.s32 4294967295, %s1226_s27   ;;  %s801_s29 = sadd.s32 4294967294, %s1226_s27   ;;  %s1226_s27 = sphi %s1283_s27, %s1544_s27   ;;  %s1222_s26 = sphi %s1281_s26, %s1543_s26   ;;  %s1218_s25 = sphi %s1279_s25, %s1542_s25   ;;  %s1214_s24 = sphi %s1277_s24, %s1541_s24  }
   0xb   : > { %p45_p0 = scmp.ne.s32.totalorder %s1218_s25, %s1214_s24  ;;  %p1517_p1 = scmp.eq.s32.totalorder %s1298_s28, 0 }
   0xc   : > { %p201_p3 = scmp.eq.s32.totalorder %s801_s29, 1  ;;  %p802_p5 = scmp.ge.s32.totalorder %s1226_s27, 1 }
   0xd   : > { %p1307_p4 = por %p1517_p1, %p45_p0  ;;  %p208_p7 = scmp.lt.s32.totalorder %s1226_s27, 3 }
   0xe   : > { %p1312_p6 = por %p201_p3, %p45_p0  ;;  %s1228_s10 = smov [#allocation5]  }
   0xf   : > { %s1523_s30 = scalar_select %p1307_p4, 1, 0 }
  0x10   : > { %s1524_s8 = scalar_select %p1312_p6, 1, 0 }
  0x11   : > { %p1317_p8 = pnand %p802_p5, %p208_p7  ;;  %s220_s11 = sshll.u32 %s1228_s10, 4  ;;  %s221_s11 = int_to_ptr.vmem [resolvable:$true] %s220_s11 }
  0x12   : > { %s1229_s13 = smov [#allocation7]   ;;  %s1230_s15 = smov [#allocation8]  }
  0x13   : > { %s1525_s9 = scalar_select %p1317_p8, 1, 0 }
  0x14   : > { %p951_p9 = pneg %p1317_p8  ;;  %s236_s14 = sshll.u32 %s1229_s13, 4  ;;  %s237_s14 = int_to_ptr.vmem [resolvable:$true] %s236_s14 }
  0x15   : > { %s252_s16 = sshll.u32 %s1230_s15, 4  ;;  %s1059_s17 = scalar_lea.vmem %s221_s11, 1024  ;;  %s253_s16 = int_to_ptr.vmem [resolvable:$true] %s252_s16 }
  0x16   : > { %p1326_p11 = pnand %p951_p9, %p1517_p1  ;;  %p1060_p13 = scmp.ne.s32.totalorder %s221_s11, %s1059_s17 }
  0x17   : > { %p1067_p5 = scmp.lt.s32.totalorder %s221_s11, %s221_s11  ;;  %p1068_p7 = scmp.lt.s32.totalorder %s1059_s17, %s1059_s17 }
  0x18   : > { %p1050_p12 = pneg %p1326_p11 }
  0x19   : > { %p1069_p9 = por %p1068_p7, %p1067_p5 }
  0x1a   : > { %p1062_p0 = pnand %p1060_p13, %p1050_p12 }
  0x1c   : > { %p1063_p3 = pneg %p1062_p0 }
  0x1e   : > { %p1070_p10 = pnand %p1069_p9, %p1063_p3 }
  0x20   : > { %1073 = shalt.err (!%p1070_p10)
}
  0x21   : > { %s1231_s18 = smov 64   ;;  %s1232_s19 = smov 4  }
  0x22   : > { %s1527_s1 = sld [smem:[#allocation15_spill]]  ;;  %s1085_s22 = scalar_lea.vmem %s237_s14, 1024 }
  0x23   : > { %p1086_p1 = scmp.ne.s32.totalorder %s237_s14, %s1085_s22  ;;  %p1093_p2 = scmp.lt.s32.totalorder %s237_s14, %s237_s14 }
  0x24   : > { %p1094_p6 = scmp.lt.s32.totalorder %s1085_s22, %s1085_s22 }
  0x25   : > { %p1088_p13 = pnand %p1086_p1, %p1050_p12 }
  0x26   : > { %p1095_p5 = por %p1094_p6, %p1093_p2 }
  0x27   : > { %p1089_p0 = pneg %p1088_p13 }
  0x28   : > { %954 = dma.hbm_to_vmem [thread:$0]  (!%p1326_p11), %s1527_s1, 1024, %s221_s11, [#allocation6], %s1231_s18, %s1231_s18, %s1232_s19  }
  0x29   : > { %p1096_p3 = pnand %p1095_p5, %p1089_p0 }
  0x2b   : > { %1099 = shalt.err (!%p1096_p3)
}
  0x2c   : > { %s1528_s3 = sld [smem:[#allocation16_spill]]  ;;  %s1111_s10 = scalar_lea.vmem %s253_s16, 1024 }
  0x2d   : > { %p1112_p10 = scmp.ne.s32.totalorder %s253_s16, %s1111_s10  ;;  %p1119_p9 = scmp.lt.s32.totalorder %s253_s16, %s253_s16 }
  0x2e   : > { %p1120_p13 = scmp.lt.s32.totalorder %s1111_s10, %s1111_s10 }
  0x2f   : > { %p1114_p7 = pnand %p1112_p10, %p1050_p12 }
  0x30   : > { %p1121_p4 = por %p1120_p13, %p1119_p9 }
  0x31   : > { %p1115_p1 = pneg %p1114_p7 }
  0x32   : > { %957 = dma.hbm_to_vmem [thread:$0]  (!%p1326_p11), %s1528_s3, 1024, %s237_s14, [#allocation6], %s1231_s18, %s1231_s18, %s1232_s19  }
  0x33   : > { %p1122_p2 = pnand %p1121_p4, %p1115_p1 }
  0x35   : > { %1125 = shalt.err (!%p1122_p2)
}
  0x36   : > { %960 = dma.hbm_to_vmem [thread:$0]  (!%p1326_p11), %s1514_s5, 1024, %s253_s16, [#allocation9], %s1231_s18, %s1231_s18, %s1232_s19  }
  0x37   : > { %s1357_s14 = sadd.s32 1, %s1226_s27   ;;  %s32_s12 = sadd.s32 1, %s1222_s26 }
  0x38   : > { %s29_s15 = ssub.s32 %s1226_s27, %s1357_s14  ;;  %p39_p6 = scmp.ne.s32.totalorder %s1222_s26, %s1218_s25 }
  0x39   : > { %p30_p4 = scmp.eq.s32.totalorder %s29_s15, 0  ;;  %p40_p12 = scmp.eq.s32.totalorder %s1226_s27, 0 }
  0x3a   : > { %p972_p0 = scmp.lt.s32.totalorder %s1226_s27, 2  ;;  %p1529_p3 = scmp.eq.s32.totalorder %s1298_s28, 1 }
  0x3b   : > { %s1367_s17 = scalar_select %p30_p4, %s1222_s26, %s32_s12  }
  0x3c   : > { %p41_p5 = por %p40_p12, %p39_p6  ;;  %p1371_p10 = por %p1529_p3, %p39_p6 }
  0x3d   : > { %s269_s21 = sand.u32 1, %s1222_s26   ;;  %s808_s22 = sshll.u32 %s1226_s27, 6 }
  0x3e   : > { %s1530_s20 = scalar_select %p1371_p10, 1, 0 }
  0x3f   : > { %s807_s16 = sshll.u32 %s269_s21, 2  ;;  %s1380_s23 = scalar_lea.hbm %s1509_s0, %s808_s22 }
  0x40   : > { %s273_s29 = scalar_lea.vmem [#allocation2], %s807_s16  ;;  %p1382_p11 = pnand %p972_p0, %p41_p5 }
  0x41   : > { %s280_s10 = sshll.u32 %s273_s29, 4  ;;  %s270_s13 = scalar_lea.sflag [#allocation3], %s269_s21  ;;  %s281_s10 = int_to_ptr.vmem [resolvable:$true] %s280_s10 }
  0x42   : > { %s1126_s15 = scalar_lea.hbm %s1380_s23, 64  ;;  %p1128_p1 = pneg %p1382_p11 }
  0x43   : > { %p1127_p7 = scmp.ne.s32.totalorder %s1380_s23, %s1126_s15  ;;  %s1131_s18 = scalar_lea.hbm %s1509_s0, 128 }
  0x44   : > { %p1132_p2 = scmp.lt.s32.totalorder %s1380_s23, %s1509_s0  ;;  %p1133_p4 = scmp.lt.s32.totalorder %s1131_s18, %s1126_s15 }
  0x45   : > { %p1129_p9 = pnand %p1128_p1, %p1127_p7 }
  0x46   : > { %p1134_p6 = por %p1133_p4, %p1132_p2 }
  0x47   : > { %p1130_p13 = pneg %p1129_p9 }
  0x49   : > { %p1135_p12 = pnand %p1134_p6, %p1130_p13 }
  0x4b   : > { %1138 = shalt.err (!%p1135_p12)
}
  0x4c   : > { %s1139_s29 = scalar_lea.vmem %s281_s10, 64  ;;  %s1233_s21 = smov [#allocation2]  }
  0x4d   : > { %p1140_p0 = scmp.ne.s32.totalorder %s281_s10, %s1139_s29  ;;  %s1144_s1 = sshll.u32 %s1233_s21, 4  ;;  %s1145_s1 = int_to_ptr.vmem [resolvable:$false] %s1144_s1 }
  0x4e   : > { %s1146_s3 = scalar_lea.vmem %s1145_s1, 128  ;;  %p1147_p7 = scmp.lt.s32.totalorder %s281_s10, %s1145_s1 }
  0x4f   : > { %p1142_p5 = pnand %p1140_p0, %p1128_p1  ;;  %p1148_p9 = scmp.lt.s32.totalorder %s1146_s3, %s1139_s29 }
  0x51   : > { %p1143_p3 = pneg %p1142_p5  ;;  %p1149_p10 = por %p1148_p9, %p1147_p7 }
  0x53   : > { %p1150_p8 = pnand %p1149_p10, %p1143_p3 }
  0x55   : > { %1153 = shalt.err (!%p1150_p8)
}
  0x56   : > { %964 = dma.hbm_to_vmem [thread:$0]  (!%p1382_p11), %s1380_s23, 64, %s281_s10, %s270_s13  }
  0x57   : > { %p1532_p13 = scmp.ne.s32.totalorder %s1525_s9, 0 }
  0x58   : > { %s1403_s15 = sand.u32 (!%p1532_p13), 1, %s1218_s25   ;;  %p1533_p1 = scmp.ne.s32.totalorder (!%p1532_p13), %s1523_s30, 0 }
  0x59   : > { %289 = sbr.rel (%p1532_p13) target bundleno = 802 (0x322), region = 48  ;;  %s810_s12 = sshll.u32 (!%p1532_p13), %s1403_s15, 2 }
  0x5a   : > { %s292_s22 = scalar_lea.sflag (!%p1532_p13), [#allocation3], %s1403_s15  ;;  %s1407_s1 = scalar_lea.vmem (!%p1532_p13), [#allocation2], %s810_s12 }
  0x5e   : > { %1197 = dma.done.wait (%p1533_p1), %s292_s22, 64  }
  0x5f   : > { %1199 = vsyncadd (%p1533_p1), %s292_s22, 4294967232  ;;  %p1534_p8 = scmp.eq.s32.totalorder %s1298_s28, 0 }
  0x61   : > { %1201 = dma.done.wait (%p1534_p8), [#allocation6], 2048   ;;  %p1535_p10 = pmov %p1534_p8 }
  0x62   : > { %p1536_p11 = pmov %p1534_p8 }
  0x63   : > { %1203 = vsyncadd (%p1535_p10), [#allocation6], 4294965248 }
  0x64   : > { %1205 = dma.done.wait (%p1536_p11), [#allocation9], 1024   ;;  %p1537_p2 = pmov %p1534_p8 }
  0x65   : > { %v1234_v0 = vmov 0.0   ;;  %vm1235_vm0 = vmmov 0   ;;  %v1016_v1 = vld [vmem:[#allocation5 + $0x38] sm:$0xff]   ;;  %v1017_v2 = vld [vmem:[#allocation5 + $0x30] sm:$0xff]   ;;  %v1018_v3 = vld [vmem:[#allocation5 + $0x28] sm:$0xff]   ;;  %s814_s10 = sshll.u32 %s1403_s15, 3 }
  0x66   : > { %1207 = vsyncadd (%p1537_p2), [#allocation9], 4294966272  ;;  %875 = vmatprep.subr.bf16.mxu0 %v1234_v0  ;;  %891 = vmatprep.mubr.msk.bf16.mxu0 %vm1235_vm0, %v1234_v0  ;;  %v1019_v4 = vld [vmem:[#allocation5 + $0x20] sm:$0xff]   ;;  %v1020_v5 = vld [vmem:[#allocation5 + $0x18] sm:$0xff]   ;;  %s845_s18 = sshll.u32 %s1298_s28, 7  ;;  %s337_s19 = scalar_lea.vmem [#allocation10], %s814_s10 }
  0x67   : > { %895 = vmatprep.subr.bf16.mxu1 %v1234_v0  ;;  %911 = vmatprep.mubr.msk.bf16.mxu1 %vm1235_vm0, %v1234_v0  ;;  %v1021_v6 = vld [vmem:[#allocation5 + $0x10] sm:$0xff]   ;;  %v1022_v7 = vld [vmem:[#allocation5 + $0x8] sm:$0xff]   ;;  %v1023_v8 = vld [vmem:[#allocation5] sm:$0xff]   ;;  %s702_s16 = sshll.u32 %s337_s19, 4  ;;  %s1466_s12 = scalar_lea.hbm %s1516_s7, %s845_s18  ;;  %s1468_s16 = int_to_ptr.vmem [resolvable:$true] %s702_s16 }
  0x68   : > { %876 = vmatpush3.bf16.msra.mxu0 %v1016_v1  ;;  %v339_v9 = vld [vmem:[%s1407_s1] sm:$0xf]  ;;  %v1025_v11 = vld [vmem:[#allocation7 + $0x30] sm:$0xff]   ;;  %v1026_v12 = vld [vmem:[#allocation7 + $0x28] sm:$0xff]   ;;  %s689_s22 = scalar_lea.sflag [#allocation4], %s1403_s15  ;;  %s1154_s1 = scalar_lea.vmem %s1468_s16, 128 }
  0x69   : > { %877 = vmatprep.subr.bf16.mxu0 %v1234_v0  ;;  %v1024_v10 = vld [vmem:[#allocation7 + $0x38] sm:$0xff]   ;;  %v1027_v13 = vld [vmem:[#allocation7 + $0x20] sm:$0xff]   ;;  %v1029_v15 = vld [vmem:[#allocation7 + $0x10] sm:$0xff]   ;;  %p1155_p4 = scmp.ne.s32.totalorder %s1468_s16, %s1154_s1  ;;  %p1538_p6 = scmp.ne.s32.totalorder %s1530_s20, 0 }
  0x6a   : > { %896 = vmatpush3.bf16.msra.mxu1 %v1024_v10  ;;  %v1028_v14 = vld [vmem:[#allocation7 + $0x18] sm:$0xff]   ;;  %v1030_v16 = vld [vmem:[#allocation7 + $0x8] sm:$0xff]   ;;  %v1031_v17 = vld [vmem:[#allocation7] sm:$0xff]   ;;  %s1236_s28 = smov [#allocation10]  }
  0x6b   : > { %897 = vmatprep.subr.bf16.mxu1 %v1234_v0  ;;  %v815_v18 = vld [vmem:[%s1511_s2] ss:$0 sm:$0xff]  ;;  %v1033_v30 = vld [vmem:[#allocation8 + $0x30] sm:$0xff]   ;;  %v1034_v31 = vld [vmem:[#allocation8 + $0x28] sm:$0xff]   ;;  %p1156_p12 = pnand %p1155_p4, %p1538_p6  ;;  %s1158_s3 = sshll.u32 %s1236_s28, 4  ;;  %s1159_s3 = int_to_ptr.vmem [resolvable:$false] %s1158_s3 }
  0x6c   : > { %878 = vmatpush3.bf16.msra.mxu0 %v1017_v2  ;;  %v1032_v29 = vld [vmem:[#allocation8 + $0x38] sm:$0xff]   ;;  %v1035_v32 = vld [vmem:[#allocation8 + $0x20] sm:$0xff]   ;;  %v1037_v34 = vld [vmem:[#allocation8 + $0x10] sm:$0xff]   ;;  %s1160_s30 = scalar_lea.vmem %s1159_s3, 256  ;;  %p1161_p5 = scmp.lt.s32.totalorder %s1468_s16, %s1159_s3 }
  0x6d   : > { %879 = vmatprep.subr.bf16.mxu0 %v1234_v0  ;;  %v1036_v33 = vld [vmem:[#allocation8 + $0x18] sm:$0xff]   ;;  %v1038_v35 = vld [vmem:[#allocation8 + $0x8] sm:$0xff]   ;;  %v1039_v36 = vld [vmem:[#allocation8] sm:$0xff]   ;;  %p1157_p0 = pneg %p1156_p12  ;;  %p1162_p3 = scmp.lt.s32.totalorder %s1160_s30, %s1154_s1 }
  0x6e   : > { %898 = vmatpush3.bf16.msra.mxu1 %v1025_v11  ;;  %v825_v37 = vld [vmem:[%s1513_s4] ss:$0 sm:$0xff] }
  0x6f   : > { %899 = vmatprep.subr.bf16.mxu1 %v1234_v0  ;;  %v835_v48 = vld [vmem:[%s1515_s6] ss:$0 sm:$0xff]  ;;  %p1163_p7 = por %p1162_p3, %p1161_p5 }
  0x70   : > { %880 = vmatpush3.bf16.msra.mxu0 %v1018_v3 }
  0x71   : > { %881 = vmatprep.subr.bf16.mxu0 %v1234_v0  ;;  %p1164_p9 = pnand %p1163_p7, %p1157_p0 }
  0x72   : > { %900 = vmatpush3.bf16.msra.mxu1 %v1026_v12 }
  0x73   : > { %901 = vmatprep.subr.bf16.mxu1 %v1234_v0 }
  0x74   : > { %882 = vmatpush3.bf16.msra.mxu0 %v1019_v4 }
  0x75   : > { %883 = vmatprep.subr.bf16.mxu0 %v1234_v0 }
  0x76   : > { %902 = vmatpush3.bf16.msra.mxu1 %v1027_v13 }
  0x77   : > { %903 = vmatprep.subr.bf16.mxu1 %v1234_v0 }
  0x78   : > { %884 = vmatpush3.bf16.msra.mxu0 %v1020_v5 }
  0x79   : > { %885 = vmatprep.subr.bf16.mxu0 %v1234_v0 }
  0x7a   : > { %904 = vmatpush3.bf16.msra.mxu1 %v1028_v14 }
  0x7b   : > { %905 = vmatprep.subr.bf16.mxu1 %v1234_v0 }
  0x7c   : > { %886 = vmatpush3.bf16.msra.mxu0 %v1021_v6 }
  0x7d   : > { %887 = vmatprep.subr.bf16.mxu0 %v1234_v0 }
  0x7e   : > { %906 = vmatpush3.bf16.msra.mxu1 %v1029_v15 }
  0x7f   : > { %907 = vmatprep.subr.bf16.mxu1 %v1234_v0 }
  0x80   : > { %888 = vmatpush3.bf16.msra.mxu0 %v1022_v7 }
  0x81   : > { %889 = vmatprep.subr.bf16.mxu0 %v1234_v0 }
  0x82   : > { %908 = vmatpush3.bf16.msra.mxu1 %v1030_v16 }
  0x83   : > { %909 = vmatprep.subr.bf16.mxu1 %v1234_v0 }
  0x84   : > { %890 = vmatpush3.bf16.msra.mxu0 %v1023_v8 }
  0x85   : > { %915 = vmatprep.subr.bf16.mxu0 %v1234_v0 }
  0x86   : > { %910 = vmatpush3.bf16.msra.mxu1 %v1031_v17 }
  0x87   : > { %892 = vmatmul.mubr.bf16.vlgmr.msra.gmra.mxu0 %v339_v9 }
  0x88   : > { %931 = vmatprep.mubr.msk.bf16.mxu0 %vm1235_vm0, %v1234_v0  ;;  %916 = vmatpush3.bf16.msra.mxu0 %v1032_v29 }
  0x89   : > { %917 = vmatprep.subr.bf16.mxu0 %v1234_v0 }
  0x8c   : > { %918 = vmatpush3.bf16.msra.mxu0 %v1033_v30 }
  0x8d   : > { %919 = vmatprep.subr.bf16.mxu0 %v1234_v0 }
  0x90   : > { %920 = vmatpush3.bf16.msra.mxu0 %v1034_v31 }
  0x91   : > { %921 = vmatprep.subr.bf16.mxu0 %v1234_v0 }
  0x94   : > { %922 = vmatpush3.bf16.msra.mxu0 %v1035_v32 }
  0x95   : > { %923 = vmatprep.subr.bf16.mxu0 %v1234_v0 }
  0x98   : > { %924 = vmatpush3.bf16.msra.mxu0 %v1036_v33 }
  0x99   : > { %925 = vmatprep.subr.bf16.mxu0 %v1234_v0 }
  0x9c   : > { %926 = vmatpush3.bf16.msra.mxu0 %v1037_v34 }
  0x9d   : > { %927 = vmatprep.subr.bf16.mxu0 %v1234_v0 }
  0xa0   : > { %928 = vmatpush3.bf16.msra.mxu0 %v1038_v35 }
  0xa1   : > { %929 = vmatprep.subr.bf16.mxu0 %v1234_v0 }
  0xa4   : > { %930 = vmatpush3.bf16.msra.mxu0 %v1039_v36 }
 0x147   : > { %v445_v19 = vpop.f32.mrf.mxu0 }
 0x148   : > { %v446_v20 = vadd.f32 %v815_v18, %v445_v19 }
 0x149   : > { %v893_v21 = vpop.f32.mrf.mxu0 }
 0x14a   : > { %v824_v22 = vmul.f32 -1.442695, %v446_v20 }
 0x14b   : > { %v448_v23 = vpop.f32.mrf.mxu0 }
 0x14c   : > { %1040 = vpow2.f32 %v824_v22 }
 0x14d   : > { %v894_v24 = vpop.f32.mrf.mxu0 }
 0x159   : > { %v1041_v25 = vpop.eup %1040 }
 0x15a   : > { %v454_v26 = vadd.f32 1.0, %v1041_v25 }
 0x15c   : > { %1042 = vrcp.f32 %v454_v26 }
 0x169   : > { %v1043_v27 = vpop.eup %1042 }
 0x16a   : > { %v457_v28 = vpack.c.bf16 %v1043_v27, %v1043_v27 }
 0x16c   : > { %912 = vmatmul.mubr.bf16.vlgmr.msra.gmra.mxu1 %v457_v28 }
 0x22c   : > { %v563_v38 = vpop.f32.mrf.mxu1 }
 0x22d   : > { %v564_v39 = vadd.f32 %v825_v37, %v563_v38 }
 0x22e   : > { %v913_v40 = vpop.f32.mrf.mxu1 }
 0x22f   : > { %v834_v41 = vmul.f32 -1.442695, %v564_v39 }
 0x230   : > { %v566_v42 = vpop.f32.mrf.mxu1 }
 0x231   : > { %1044 = vpow2.f32 %v834_v41 }
 0x232   : > { %v914_v43 = vpop.f32.mrf.mxu1 }
 0x23e   : > { %v1045_v44 = vpop.eup %1044 }
 0x23f   : > { %v572_v45 = vadd.f32 1.0, %v1045_v44 }
 0x241   : > { %1046 = vrcp.f32 %v572_v45 }
 0x24e   : > { %v1047_v46 = vpop.eup %1046 }
 0x24f   : > { %v575_v47 = vpack.c.bf16 %v1047_v46, %v1047_v46 }
 0x251   : > { %932 = vmatmul.mubr.bf16.vlgmr.msra.gmra.mxu0 %v575_v47 }
 0x311   : > { %v681_v49 = vpop.f32.mrf.mxu0 }
 0x312   : > { %v682_v50 = vadd.f32 %v835_v48, %v681_v49 }
 0x313   : > { %v933_v51 = vpop.f32.mrf.mxu0 }
 0x314   : > { %687 = vst [vmem:[%s337_s19] sm:$0xff] %v682_v50 }
 0x315   : > { %v684_v52 = vpop.f32.mrf.mxu0 }
 0x316   : > { %1167 = shalt.err (!%p1164_p9)
}
 0x317   : > { %s1168_s9 = scalar_lea.hbm %s1466_s12, 128  ;;  %s1172_s10 = scalar_lea.hbm %s1516_s7, 256 }
 0x318   : > { %p1169_p13 = scmp.ne.s32.totalorder %s1466_s12, %s1168_s9  ;;  %p1173_p10 = scmp.lt.s32.totalorder %s1466_s12, %s1516_s7 }
 0x319   : > { %p1174_p11 = scmp.lt.s32.totalorder %s1172_s10, %s1168_s9 }
 0x31a   : > { %p1170_p1 = pnand %p1169_p13, %p1538_p6 }
 0x31b   : > { %p1175_p2 = por %p1174_p11, %p1173_p10 }
 0x31c   : > { %p1171_p8 = pneg %p1170_p1 }
 0x31e   : > { %p1176_p4 = pnand %p1175_p2, %p1171_p8 }
 0x320   : > { %1179 = shalt.err (!%p1176_p4)
}
 0x321   : > { %949 = dma.vmem_to_hbm [thread:$0]  (%p1538_p6), %s1468_s16, 128, %s1466_s12, %s689_s22   ;;  %v934_v53 = vpop.f32.mrf.mxu0 }
 0x322 PF: > { %s714_s18 = sand.u32 1, %s1214_s24   ;;  %p1539_p12 = scmp.ne.s32.totalorder %s1524_s8, 0 }
 0x323   : > { %p1540_p0 = scmp.ge.s32.totalorder %s1226_s27, 2  ;;  %s715_s19 = scalar_lea.sflag [#allocation4], %s714_s18 }
 0x325   : > { %p966_p5 = pnand %p1540_p0, %p1539_p12 }
 0x327   : > { %p967_p3 = pneg %p966_p5 }
 0x329   : > { %1209 = dma.done.wait (%p967_p3), %s715_s19, 128  }
 0x32a   : > { %1211 = vsyncadd (%p967_p3), %s715_s19, 4294967168  ;;  %p22_p7 = scmp.ge.s32.totalorder %s1357_s14, 4   ;;  %s1541_s24 = smov %s1218_s25 }
 0x32b   : > { %s1542_s25 = smov %s1222_s26  ;;  %s1543_s26 = smov %s1367_s17 }
 0x32c   : > { %s1544_s27 = smov %s1357_s14  ;;  %24 = sbr.rel (!%p22_p7) target bundleno = 10 (0xa), region = 105 }
 0x331   :  { %720 = vsyncpa [#allocation3], 1 }
 0x332   :  { %722 = vsyncpa [#allocation3 + $0x1], 1 }
 0x333   :  { %723 = vsyncpa [#allocation6], 1 }
 0x334   :  { %724 = vsyncpa [#allocation9], 1 }
 0x335   :  { %725 = vsyncpa [#allocation4], 1 }
 0x336   :  { %727 = vsyncpa [#allocation4 + $0x1], 1 }

</bundles_post_ra>
